<compile_context>
chip_gen: v6e
topology: v6e:2x2x1
jax: 0.10.0
libtpu: 0.0.40
codegen_flags: <defaults>
</compile_context>

<pallas_src>
import functools

import jax
import jax.numpy as jnp
from jax.experimental import pallas as pl
from jax.experimental.pallas import tpu as pltpu


def _round_up(x, m):
    return ((x + m - 1) // m) * m


def pack_critic_params(params, obs_dim, act_dim):
    """Pack PyTorch-layout params (W: [out, in], b: [out]) into one f32 slab.

    Slab layout (all sections start at an 8-aligned row, column 0):
      layer 0:  W0[:, :obs_dim]  (h0, obs_dim)
                W0[:, obs_dim:]  (h0, act_dim)
                b0 as a column   (h0, 1)
      layer i>=1: W_i            (out_i, in_i)
                  b_i as column  (out_i, 1)
    Returns (slab, layout, dims_in, dims_out).
    """
    num_layers = len(params)
    dims_in = [int(w.shape[1]) for (w, _) in params]
    dims_out = [int(w.shape[0]) for (w, _) in params]
    assert dims_in[0] == obs_dim + act_dim
    assert dims_out[-1] == 1

    width = max(dims_in)
    rows = 0
    layout = []

    h0 = dims_out[0]
    w0_obs_off = rows
    rows = _round_up(rows + h0, 8)
    w0_act_off = rows
    rows = _round_up(rows + h0, 8)
    b0_off = rows
    rows = _round_up(rows + h0, 8)
    layout.append((w0_obs_off, w0_act_off, b0_off))

    for i in range(1, num_layers):
        w_off = rows
        rows = _round_up(rows + dims_out[i], 8)
        b_off = rows
        rows = _round_up(rows + dims_out[i], 8)
        layout.append((w_off, b_off))

    total_rows = _round_up(rows, 8)
    slab = jnp.zeros((total_rows, width), jnp.float32)

    w0, b0 = params[0]
    w0 = w0.astype(jnp.float32)
    b0 = b0.astype(jnp.float32).reshape(-1)
    slab = slab.at[w0_obs_off:w0_obs_off + h0, :obs_dim].set(w0[:, :obs_dim])
    slab = slab.at[w0_act_off:w0_act_off + h0, :act_dim].set(w0[:, obs_dim:])
    slab = slab.at[b0_off:b0_off + h0, 0].set(b0)

    for i in range(1, num_layers):
        w, b = params[i]
        w_off, b_off = layout[i]
        o, k = dims_out[i], dims_in[i]
        slab = slab.at[w_off:w_off + o, :k].set(w.astype(jnp.float32))
        slab = slab.at[b_off:b_off + o, 0].set(b.astype(jnp.float32).reshape(-1))

    return slab, layout, dims_in, dims_out


def _make_critic_kernel(obs_dim, act_dim, layout, dims_in, dims_out, tb):
    """Fused MLP kernel operating on one batch tile of size `tb`.

    Inputs: obs_ref (tb, obs_dim), act_ref (tb, act_dim), p_ref (slab),
    output: o_ref (1, 1, tb) lane-dense Q row for this tile.
    """
    num_layers = len(dims_in)

    def _dot_nt(a, b):
        # (m, k) x (n, k) -> (m, n): contract both operands on their last dim
        # (same pattern as attention QK^T; MXU-friendly).
        return jax.lax.dot_general(a, b, (((1,), (1,)), ((), ())),
                                   preferred_element_type=jnp.float32)

    def kernel(obs_ref, act_ref, p_ref, o_ref):
        obs = obs_ref[...].astype(jnp.float32)   # (tb, obs_dim)
        act = act_ref[...].astype(jnp.float32)   # (tb, act_dim)

        # ---- layer 0: concat folded in; result is (h0, tb), batch on lanes.
        w0_obs_off, w0_act_off, b0_off = layout[0]
        h0 = dims_out[0]
        w0o = p_ref[w0_obs_off:w0_obs_off + h0, :obs_dim]   # (h0, obs_dim)
        w0a = p_ref[w0_act_off:w0_act_off + h0, :act_dim]   # (h0, act_dim)
        b0 = p_ref[b0_off:b0_off + h0, 0:1]                  # (h0, 1)
        h = _dot_nt(w0o, obs) + _dot_nt(w0a, act) + b0       # (h0, tb)
        if num_layers > 1:
            h = jnp.maximum(h, 0.0)

        # ---- layers 1..L-1 (static unroll; weights stay in (out, in) layout).
        for i in range(1, num_layers):
            w_off, b_off = layout[i]
            o, k = dims_out[i], dims_in[i]
            w = p_ref[w_off:w_off + o, :k]          # (out, in)
            b = p_ref[b_off:b_off + o, 0:1]         # (out, 1)
            h = jnp.dot(w, h, preferred_element_type=jnp.float32) + b
            if i < num_layers - 1:
                h = jnp.maximum(h, 0.0)

        # h is (1, tb): lane-dense, full-width store.
        o_ref[...] = h.reshape(1, 1, tb).astype(o_ref.dtype)

    return kernel


def critic_forward(observation, action, params, *, block_batch=1024):
    """Pallas implementation of Critic.forward.

    observation: [B, obs_dim] float32
    action:      [B, act_dim] float32
    params: list of (W, b) in PyTorch nn.Linear layout, W: [out, in], b: [out]
    returns: [B, 1] float32 Q-values
    """
    obs = observation.astype(jnp.float32)
    act = action.astype(jnp.float32)
    batch, obs_dim = obs.shape
    act_dim = act.shape[1]

    slab, layout, dims_in, dims_out = pack_critic_params(params, obs_dim, act_dim)
    rows, width = slab.shape

    # Batch tile: multiple of 128 (lane-dense output), no larger than needed.
    tb = max(128, (int(block_batch) // 128) * 128)
    tb = min(tb, _round_up(batch, 128))
    grid = pl.cdiv(batch, tb)
    padded = grid * tb
    if padded != batch:
        obs = jnp.pad(obs, ((0, padded - batch), (0, 0)))
        act = jnp.pad(act, ((0, padded - batch), (0, 0)))

    kernel = _make_critic_kernel(obs_dim, act_dim, layout, dims_in, dims_out, tb)

    out = pl.pallas_call(
        kernel,
        out_shape=jax.ShapeDtypeStruct((grid, 1, tb), jnp.float32),
        grid=(grid,),
        in_specs=[
            pl.BlockSpec((tb, obs_dim), lambda i: (i, 0)),
            pl.BlockSpec((tb, act_dim), lambda i: (i, 0)),
            # Parameter slab: constant block index -> DMA'd once, resident.
            pl.BlockSpec((rows, width), lambda i: (0, 0)),
        ],
        out_specs=pl.BlockSpec((1, 1, tb), lambda i: (i, 0, 0)),
        compiler_params=pltpu.CompilerParams(
            dimension_semantics=("parallel",)),
    )(obs, act, slab)

    return out.reshape(padded)[:batch].reshape(batch, 1)


def init_critic_params(key, input_dim, hidden_dims):
    """nn.Linear default init (uniform +/- 1/sqrt(fan_in)), PyTorch layout."""
    dims = [input_dim] + list(hidden_dims) + [1]
    params = []
    for i in range(len(dims) - 1):
        fan_in, fan_out = dims[i], dims[i + 1]
        key, kw, kb = jax.random.split(key, 3)
        bound = 1.0 / (fan_in ** 0.5)
        w = jax.random.uniform(kw, (fan_out, fan_in), jnp.float32, -bound, bound)
        b = jax.random.uniform(kb, (fan_out,), jnp.float32, -bound, bound)
        params.append((w, b))
    return params


def critic_reference(observation, action, params):
    """Pure-JAX reference matching the PyTorch module."""
    h = jnp.concatenate([observation, action], axis=-1).astype(jnp.float32)
    n = len(params)
    for i, (w, b) in enumerate(params):
        h = h @ w.T + b
        if i < n - 1:
            h = jnp.maximum(h, 0.0)
    return h


if __name__ == "__main__":
    # Pendulum-v1: obs_dim=3, act_dim=1 -> input_dim=4; hidden_dims=(32, 32).
    obs_dim, act_dim = 3, 1
    hidden_dims = (32, 32)
    batch = 1000   # not a multiple of the tile -> exercises grid + padding path

    key = jax.random.PRNGKey(0)
    k_obs, k_act, k_par = jax.random.split(key, 3)

    observation = jax.random.normal(k_obs, (batch, obs_dim), jnp.float32)
    action = jax.random.normal(k_act, (batch, act_dim), jnp.float32)
    params = init_critic_params(k_par, obs_dim + act_dim, hidden_dims)

    fwd = jax.jit(functools.partial(critic_forward, block_batch=256))
    q = jax.block_until_ready(fwd(observation, action, params))

    q_ref = critic_reference(observation, action, params)
    assert q.shape == (batch, 1), q.shape
    max_err = float(jnp.max(jnp.abs(q - q_ref)))
    assert jnp.allclose(q, q_ref, atol=1e-4, rtol=1e-4), max_err

    print("KERNEL_OK")
</pallas_src>

<mosaic_0001>
module attributes {stable_mosaic.version = 11 : i64} {
  func.func @kernel(%arg0: i32, %arg1: memref<256x3xf32, #tpu.memory_space<vmem>>, %arg2: memref<256x1xf32, #tpu.memory_space<vmem>>, %arg3: memref<176x32xf32, #tpu.memory_space<vmem>>, %arg4: memref<1x1x256xf32, #tpu.memory_space<vmem>>) attributes {dimension_semantics = [#tpu.dimension_semantics<parallel>], iteration_bounds = array<i64: 4>, scalar_prefetch = 0 : i64, scratch_operands = 0 : i64, tpu.core_type = #tpu.core_type<tc>, window_params = [{transform_indices = @transform_0, window_bounds = array<i64: 256, 3>}, {transform_indices = @transform_1, window_bounds = array<i64: 256, 1>}, {pipeline_mode = #tpu.pipeline_mode<synchronous>, transform_indices = @transform_2, window_bounds = array<i64: 176, 32>}, {transform_indices = @transform_3, window_bounds = array<i64: 1, 1, 256>}]} {
    %c0 = arith.constant 0 : index
    %c0_0 = arith.constant 0 : index
    %0 = vector.load %arg1[%c0, %c0_0] : memref<256x3xf32, #tpu.memory_space<vmem>>, vector<256x3xf32>
    %c0_1 = arith.constant 0 : index
    %c0_2 = arith.constant 0 : index
    %1 = vector.load %arg2[%c0_1, %c0_2] : memref<256x1xf32, #tpu.memory_space<vmem>>, vector<256x1xf32>
    %c0_3 = arith.constant 0 : index
    %c0_4 = arith.constant 0 : index
    %2 = vector.load %arg3[%c0_3, %c0_4] : memref<176x32xf32, #tpu.memory_space<vmem>>, vector<32x3xf32>
    %c32 = arith.constant 32 : index
    %c0_5 = arith.constant 0 : index
    %3 = vector.load %arg3[%c32, %c0_5] : memref<176x32xf32, #tpu.memory_space<vmem>>, vector<32x1xf32>
    %c64 = arith.constant 64 : index
    %c0_6 = arith.constant 0 : index
    %4 = vector.load %arg3[%c64, %c0_6] : memref<176x32xf32, #tpu.memory_space<vmem>>, vector<32x1xf32>
    %cst = arith.constant dense<0.000000e+00> : vector<32x256xf32>
    %5 = tpu.matmul %2, %0, %cst {dimension_numbers = #tpu.dot_dimension_numbers<[1], [1], [0], [0], [0, 0, 1, 0], [], []>} : vector<32x3xf32>, vector<256x3xf32>, vector<32x256xf32> -> vector<32x256xf32>
    %cst_7 = arith.constant dense<0.000000e+00> : vector<32x256xf32>
    %6 = tpu.matmul %3, %1, %cst_7 {dimension_numbers = #tpu.dot_dimension_numbers<[1], [1], [0], [0], [0, 0, 1, 0], [], []>} : vector<32x1xf32>, vector<256x1xf32>, vector<32x256xf32> -> vector<32x256xf32>
    %7 = arith.addf %5, %6 : vector<32x256xf32>
    %8 = vector.broadcast %4 : vector<32x1xf32> to vector<32x256xf32>
    %9 = arith.addf %7, %8 : vector<32x256xf32>
    %cst_8 = arith.constant 0.000000e+00 : f32
    %10 = vector.broadcast %cst_8 : f32 to vector<32x256xf32>
    %11 = arith.maximumf %9, %10 : vector<32x256xf32>
    %c96 = arith.constant 96 : index
    %c0_9 = arith.constant 0 : index
    %12 = vector.load %arg3[%c96, %c0_9] : memref<176x32xf32, #tpu.memory_space<vmem>>, vector<32x32xf32>
    %c128 = arith.constant 128 : index
    %c0_10 = arith.constant 0 : index
    %13 = vector.load %arg3[%c128, %c0_10] : memref<176x32xf32, #tpu.memory_space<vmem>>, vector<32x1xf32>
    %cst_11 = arith.constant dense<0.000000e+00> : vector<32x256xf32>
    %14 = tpu.matmul %12, %11, %cst_11 {dimension_numbers = #tpu.dot_dimension_numbers<[1], [0], [0], [1], [0, 0, 1, 1], [], []>} : vector<32x32xf32>, vector<32x256xf32>, vector<32x256xf32> -> vector<32x256xf32>
    %15 = vector.broadcast %13 : vector<32x1xf32> to vector<32x256xf32>
    %16 = arith.addf %14, %15 : vector<32x256xf32>
    %cst_12 = arith.constant 0.000000e+00 : f32
    %17 = vector.broadcast %cst_12 : f32 to vector<32x256xf32>
    %18 = arith.maximumf %16, %17 : vector<32x256xf32>
    %c160 = arith.constant 160 : index
    %c0_13 = arith.constant 0 : index
    %19 = vector.load %arg3[%c160, %c0_13] : memref<176x32xf32, #tpu.memory_space<vmem>>, vector<1x32xf32>
    %c168 = arith.constant 168 : index
    %c0_14 = arith.constant 0 : index
    %20 = vector.load %arg3[%c168, %c0_14] : memref<176x32xf32, #tpu.memory_space<vmem>>, vector<1x1xf32>
    %cst_15 = arith.constant dense<0.000000e+00> : vector<1x256xf32>
    %21 = tpu.matmul %19, %18, %cst_15 {dimension_numbers = #tpu.dot_dimension_numbers<[1], [0], [0], [1], [0, 0, 1, 1], [], []>} : vector<1x32xf32>, vector<32x256xf32>, vector<1x256xf32> -> vector<1x256xf32>
    %22 = vector.broadcast %20 : vector<1x1xf32> to vector<1x256xf32>
    %23 = arith.addf %21, %22 : vector<1x256xf32>
    %24 = vector.shape_cast %23 : vector<1x256xf32> to vector<1x1x256xf32>
    %c0_16 = arith.constant 0 : index
    %c0_17 = arith.constant 0 : index
    %c0_18 = arith.constant 0 : index
    %25 = vector.load %arg4[%c0_16, %c0_17, %c0_18] : memref<1x1x256xf32, #tpu.memory_space<vmem>>, vector<1x1x256xf32>
    tpu.vector_store %arg4[%c0_16, %c0_17, %c0_18], %24 {strides = array<i32>} : memref<1x1x256xf32, #tpu.memory_space<vmem>>, vector<1x1x256xf32>,
    return
  }
  func.func @transform_0(%arg0: i32) -> (i32, i32) {
    %c0_i32 = arith.constant 0 : i32
    %c0_i32_0 = arith.constant 0 : i32
    return %arg0, %c0_i32 : i32, i32
  }
  func.func @transform_1(%arg0: i32) -> (i32, i32) {
    %c0_i32 = arith.constant 0 : i32
    %c0_i32_0 = arith.constant 0 : i32
    return %arg0, %c0_i32 : i32, i32
  }
  func.func @transform_2(%arg0: i32) -> (i32, i32) {
    %c0_i32 = arith.constant 0 : i32
    %c0_i32_0 = arith.constant 0 : i32
    %c0_i32_1 = arith.constant 0 : i32
    return %c0_i32, %c0_i32_0 : i32, i32
  }
  func.func @transform_3(%arg0: i32) -> (i32, i32, i32) {
    %c0_i32 = arith.constant 0 : i32
    %c0_i32_0 = arith.constant 0 : i32
    %c0_i32_1 = arith.constant 0 : i32
    return %arg0, %c0_i32, %c0_i32_0 : i32, i32, i32
  }
}

</mosaic_0001>

<bundles_post_ra>
// kernel: critic_forward.1
= control target key start
LH: loop header
LB: loop body
LE: loop exit
PB: predicated region body
PF: predicated region fallthrough
CT: control target
= control target key end

     0   :  { %8 = vsyncpa [#allocation3], 0  ;;  %s1652_s0 = inlined_call_operand.vmem [shape: f32[1024,3], index: 0, kind: input, shape index: {}]   ;;  %s1653_s1 = inlined_call_operand.vmem [shape: f32[1024,1], index: 1, kind: input, shape index: {}]   ;;  %s1654_s2 = inlined_call_operand.vmem [shape: f32[176,32], index: 2, kind: input, shape index: {}]   ;;  %s1655_s3 = inlined_call_operand.hbm [shape: f32[4,1,256], index: 3, kind: output, shape index: {}]  }
   0x1   :  { %10 = vsyncpa [#allocation3 + $0x1], 0  ;;  %s1331_s12 = smov 0   ;;  %s1333_s13 = smov 0  }
   0x2   :  { %s1335_s14 = smov 0   ;;  %s1337_s15 = smov 0  }
   0x3 LB: > { %s1028_s16 = sadd.s32 4294967295, %s1305_s15   ;;  %s1029_s17 = sadd.s32 4294967294, %s1305_s15   ;;  %s1305_s15 = sphi %s1337_s15, %s1661_s15   ;;  %s1301_s14 = sphi %s1335_s14, %s1660_s14   ;;  %s1297_s13 = sphi %s1333_s13, %s1659_s13   ;;  %s1293_s12 = sphi %s1331_s12, %s1658_s12  }
   0x4   : > { %s1354_s18 = sadd.s32 1, %s1305_s15   ;;  %s96_s19 = sadd.s32 1, %s1301_s14 }
   0x5   : > { %s93_s20 = ssub.s32 %s1305_s15, %s1354_s18  ;;  %p106_p0 = scmp.ne.s32.totalorder %s1301_s14, %s1297_s13 }
   0x6   : > { %p94_p1 = scmp.eq.s32.totalorder %s93_s20, 0  ;;  %p107_p2 = scmp.eq.s32.totalorder %s1028_s16, 3 }
   0x7   : > { %p112_p3 = scmp.ne.s32.totalorder %s1297_s13, %s1293_s12  ;;  %p113_p4 = scmp.eq.s32.totalorder %s1029_s17, 3 }
   0x8   : > { %s1364_s21 = scalar_select %p94_p1, %s1301_s14, %s96_s19  }
   0x9   : > { %p1366_p5 = por %p107_p2, %p106_p0  ;;  %p1370_p6 = por %p113_p4, %p112_p3 }
   0xa   : > { %p1032_p7 = scmp.ge.s32.totalorder %s1305_s15, 1  ;;  %p152_p8 = scmp.lt.s32.totalorder %s1305_s15, 5 }
   0xc   : > { %p153_p9 = pnand %p1032_p7, %p152_p8 }
   0xd   : > { %s1376_s24 = sshll.u32 (!%p153_p9), %s1028_s16, 5  ;;  %s1310_s5 = smov (!%p153_p9), [#allocation2]  }
   0xe   : > { %156 = sbr.rel (%p153_p9) target bundleno = 746 (0x2ea), region = 32  ;;  %p182_p10 = scmp.lt.s32.totalorder (!%p153_p9), %s1376_s24, 127 }
   0xf   : > { %s956_s29 = scalar_lea.hbm (!%p153_p9), %s1655_s3, %s1376_s24  ;;  %s1249_s6 = sshll.u32 (!%p153_p9), %s1310_s5, 4  ;;  %s1250_s6 = int_to_ptr.vmem [resolvable:$false] %s1249_s6 }
  0x10   : > { %s1251_s7 = scalar_lea.vmem (!%p153_p9), %s1250_s6, 64 }
  0x13   : > { %vm269_vm0 = vcmask 7168   ;;  %vm467_vm1 = vcmask 23552   ;;  %v1381_v0 = vld [vmem:[%s1654_s2 + $0x20] sm:$0xff]  ;;  %v1307_v2 = vmov 0   ;;  %v268_v3 = vld [vmem:[%s1654_s2 + $0x58] sm:$0xff]  ;;  %s183_s4 = scalar_select %p182_p10, %s1376_s24, 127 }
  0x14   : > { %v1386_v1 = vld [vmem:[%s1654_s2] sm:$0xff]  ;;  %1153 = vmatprep.mubr.msk.f32.mxu0 %vm269_vm0, %v1381_v0  ;;  %1244 = vset.pattern.permute.xlu1 %v1307_v2  ;;  %v266_v4 = vld [vmem:[%s1654_s2 + $0x48] sm:$0xff]  ;;  %v267_v5 = vld [vmem:[%s1654_s2 + $0x50] sm:$0xff]  ;;  %vm729_vm2 = vcmask 261120  }
  0x15   : > { %1193 = vmatprep.mubr.msk.f32.mxu1 %vm467_vm1, %v1386_v1  ;;  %1243 = vset.pattern.permute.xlu0 %v1307_v2  ;;  %s1035_s9 = sshll.u32 %s183_s4, 3  ;;  %v265_v6 = vld [vmem:[%s1654_s2 + $0x40] sm:$0xff]  ;;  %v708_v7 = vld [vmem:[%s1654_s2 + $0x98] sm:$0xff]  ;;  %v706_v18 = vld [vmem:[%s1654_s2 + $0x88] sm:$0xff] }
  0x16   : > { %682 = vperm.xlu0 %1243, %v268_v3   ;;  %672 = vperm.xlu1 %1244, %v266_v4   ;;  %s1406_s16 = scalar_lea.vmem %s1653_s1, %s1035_s9  ;;  %s1411_s20 = scalar_lea.vmem %s1652_s0, %s1035_s9  ;;  %v707_v19 = vld [vmem:[%s1654_s2 + $0x90] sm:$0xff]  ;;  %v840_v24 = vld [vmem:[%s1654_s2 + $0xa8] sm:$0x1]  ;;  %v705_v25 = vld [vmem:[%s1654_s2 + $0x80] sm:$0xff] }
  0x17   : > { %v256_v8 = vld [vmem:[%s1406_s16 + $0xf8] sm:$0xff]  ;;  %v255_v12 = vld [vmem:[%s1406_s16 + $0xf0] sm:$0xff]  ;;  %v254_v16 = vld [vmem:[%s1406_s16 + $0xe8] sm:$0xff] }
  0x18   : > { %v224_v9 = vld [vmem:[%s1411_s20 + $0xf8] sm:$0xff]  ;;  %1121 = vmatprep.subr.msk.mxu0 %vm269_vm0, %v256_v8  ;;  %v223_v13 = vld [vmem:[%s1411_s20 + $0xf0] sm:$0xff]  ;;  %v222_v17 = vld [vmem:[%s1411_s20 + $0xe8] sm:$0xff] }
  0x19   : > { %v240_v10 = vld [vmem:[%s1406_s16 + $0x78] sm:$0xff]  ;;  %1161 = vmatprep.subr.msk.mxu1 %vm467_vm1, %v224_v9  ;;  %v239_v14 = vld [vmem:[%s1406_s16 + $0x70] sm:$0xff]  ;;  %v238_v20 = vld [vmem:[%s1406_s16 + $0x68] sm:$0xff] }
  0x1a   : > { %677 = vperm.xlu0 %1243, %v267_v5   ;;  %v208_v11 = vld [vmem:[%s1411_s20 + $0x78] sm:$0xff]  ;;  %1122 = vmatpush3.xpose.msk.msra.mxu0 %vm269_vm0, %v240_v10  ;;  %v207_v15 = vld [vmem:[%s1411_s20 + $0x70] sm:$0xff]  ;;  %v206_v21 = vld [vmem:[%s1411_s20 + $0x68] sm:$0xff] }
  0x1b   : > { %1162 = vmatpush3.xpose.msk.msra.mxu1 %vm467_vm1, %v208_v11  ;;  %1123 = vmatprep.subr.msk.mxu0 %vm269_vm0, %v255_v12  ;;  %v253_v22 = vld [vmem:[%s1406_s16 + $0xe0] sm:$0xff]  ;;  %v252_v28 = vld [vmem:[%s1406_s16 + $0xd8] sm:$0xff]  ;;  %v251_v32 = vld [vmem:[%s1406_s16 + $0xd0] sm:$0xff] }
  0x1c   : > { %1163 = vmatprep.subr.msk.mxu1 %vm467_vm1, %v223_v13  ;;  %667 = vperm.xlu1 %1244, %v265_v6   ;;  %v221_v23 = vld [vmem:[%s1411_s20 + $0xe0] sm:$0xff]  ;;  %v220_v29 = vld [vmem:[%s1411_s20 + $0xd8] sm:$0xff]  ;;  %v219_v33 = vld [vmem:[%s1411_s20 + $0xd0] sm:$0xff] }
  0x1d   : > { %v237_v26 = vld [vmem:[%s1406_s16 + $0x60] sm:$0xff]  ;;  %v236_v30 = vld [vmem:[%s1406_s16 + $0x58] sm:$0xff]  ;;  %v235_v34 = vld [vmem:[%s1406_s16 + $0x50] sm:$0xff] }
  0x1e   : > { %726 = vperm.xlu0 %1243, %v708_v7   ;;  %1124 = vmatpush3.xpose.msk.msra.mxu0 %vm269_vm0, %v239_v14  ;;  %v205_v27 = vld [vmem:[%s1411_s20 + $0x60] sm:$0xff]  ;;  %v204_v31 = vld [vmem:[%s1411_s20 + $0x58] sm:$0xff]  ;;  %v203_v35 = vld [vmem:[%s1411_s20 + $0x50] sm:$0xff] }
  0x1f   : > { %1164 = vmatpush3.xpose.msk.msra.mxu1 %vm467_vm1, %v207_v15  ;;  %1125 = vmatprep.subr.msk.mxu0 %vm269_vm0, %v254_v16  ;;  %v250_v36 = vld [vmem:[%s1406_s16 + $0xc8] sm:$0xff]  ;;  %v249_v40 = vld [vmem:[%s1406_s16 + $0xc0] sm:$0xff]  ;;  %v248_v44 = vld [vmem:[%s1406_s16 + $0xb8] sm:$0xff] }
  0x20   : > { %1165 = vmatprep.subr.msk.mxu1 %vm467_vm1, %v222_v17  ;;  %721 = vperm.xlu1 %1244, %v707_v19   ;;  %v218_v37 = vld [vmem:[%s1411_s20 + $0xc8] sm:$0xff]  ;;  %v217_v41 = vld [vmem:[%s1411_s20 + $0xc0] sm:$0xff]  ;;  %v216_v45 = vld [vmem:[%s1411_s20 + $0xb8] sm:$0xff] }
  0x21   : > { %v234_v38 = vld [vmem:[%s1406_s16 + $0x48] sm:$0xff]  ;;  %v233_v42 = vld [vmem:[%s1406_s16 + $0x40] sm:$0xff]  ;;  %v232_v46 = vld [vmem:[%s1406_s16 + $0x38] sm:$0xff] }
  0x22   : > { %716 = vperm.xlu0 %1243, %v706_v18   ;;  %1126 = vmatpush3.xpose.msk.msra.mxu0 %vm269_vm0, %v238_v20  ;;  %v202_v39 = vld [vmem:[%s1411_s20 + $0x48] sm:$0xff]  ;;  %v201_v43 = vld [vmem:[%s1411_s20 + $0x40] sm:$0xff]  ;;  %v200_v47 = vld [vmem:[%s1411_s20 + $0x38] sm:$0xff]  ;;  %v1308_v18 = vmov 0.0  }
  0x23   : > { %1166 = vmatpush3.xpose.msk.msra.mxu1 %vm467_vm1, %v206_v21  ;;  %1127 = vmatprep.subr.msk.mxu0 %vm269_vm0, %v253_v22  ;;  %v247_v48 = vld [vmem:[%s1406_s16 + $0xb0] sm:$0xff]  ;;  %v246_v52 = vld [vmem:[%s1406_s16 + $0xa8] sm:$0xff]  ;;  %v245_v56 = vld [vmem:[%s1406_s16 + $0xa0] sm:$0xff] }
  0x24   : > { %1167 = vmatprep.subr.msk.mxu1 %vm467_vm1, %v221_v23  ;;  %711 = vperm.xlu1 %1244, %v705_v25   ;;  %v215_v49 = vld [vmem:[%s1411_s20 + $0xb0] sm:$0xff]  ;;  %v214_v53 = vld [vmem:[%s1411_s20 + $0xa8] sm:$0xff]  ;;  %v213_v57 = vld [vmem:[%s1411_s20 + $0xa0] sm:$0xff] }
  0x25   : > { %v231_v50 = vld [vmem:[%s1406_s16 + $0x30] sm:$0xff]  ;;  %v230_v54 = vld [vmem:[%s1406_s16 + $0x28] sm:$0xff]  ;;  %v229_v58 = vld [vmem:[%s1406_s16 + $0x20] sm:$0xff] }
  0x26   : > { %843 = vperm.xlu0 %1243, %v840_v24   ;;  %1128 = vmatpush3.xpose.msk.msra.mxu0 %vm269_vm0, %v237_v26  ;;  %v199_v51 = vld [vmem:[%s1411_s20 + $0x30] sm:$0xff]  ;;  %v198_v55 = vld [vmem:[%s1411_s20 + $0x28] sm:$0xff]  ;;  %v197_v59 = vld [vmem:[%s1411_s20 + $0x20] sm:$0xff] }
  0x27   : > { %1168 = vmatpush3.xpose.msk.msra.mxu1 %vm467_vm1, %v205_v27  ;;  %1129 = vmatprep.subr.msk.mxu0 %vm269_vm0, %v252_v28  ;;  %v244_v60 = vld [vmem:[%s1406_s16 + $0x98] sm:$0xff]  ;;  %v243_v2 = vld [vmem:[%s1406_s16 + $0x90] sm:$0xff]  ;;  %v242_v6 = vld [vmem:[%s1406_s16 + $0x88] sm:$0xff] }
  0x28   : > { %1169 = vmatprep.subr.msk.mxu1 %vm467_vm1, %v220_v29  ;;  %v212_v61 = vld [vmem:[%s1411_s20 + $0x98] sm:$0xff]  ;;  %v211_v3 = vld [vmem:[%s1411_s20 + $0x90] sm:$0xff]  ;;  %v210_v7 = vld [vmem:[%s1411_s20 + $0x88] sm:$0xff] }
  0x29   : > { %v228_v62 = vld [vmem:[%s1406_s16 + $0x18] sm:$0xff]  ;;  %v227_v4 = vld [vmem:[%s1406_s16 + $0x10] sm:$0xff]  ;;  %v226_v8 = vld [vmem:[%s1406_s16 + $0x8] sm:$0xff] }
  0x2a   : > { %1130 = vmatpush3.xpose.msk.msra.mxu0 %vm269_vm0, %v236_v30  ;;  %v196_v63 = vld [vmem:[%s1411_s20 + $0x18] sm:$0xff]  ;;  %v195_v5 = vld [vmem:[%s1411_s20 + $0x10] sm:$0xff]  ;;  %v194_v9 = vld [vmem:[%s1411_s20 + $0x8] sm:$0xff] }
  0x2b   : > { %1170 = vmatpush3.xpose.msk.msra.mxu1 %vm467_vm1, %v204_v31  ;;  %1131 = vmatprep.subr.msk.mxu0 %vm269_vm0, %v251_v32  ;;  %v241_v10 = vld [vmem:[%s1406_s16 + $0x80] sm:$0xff]  ;;  %v262_v14 = vld [vmem:[%s1654_s2 + $0x28] sm:$0xff]  ;;  %v263_v16 = vld [vmem:[%s1654_s2 + $0x30] sm:$0xff] }
  0x2c   : > { %1171 = vmatprep.subr.msk.mxu1 %vm467_vm1, %v219_v33  ;;  %v209_v11 = vld [vmem:[%s1411_s20 + $0x80] sm:$0xff]  ;;  %v258_v15 = vld [vmem:[%s1654_s2 + $0x8] sm:$0xff]  ;;  %v259_v17 = vld [vmem:[%s1654_s2 + $0x10] sm:$0xff] }
  0x2d   : > { %v225_v12 = vld [vmem:[%s1406_s16] sm:$0xff]  ;;  %s178_s16 = sand.u32 1, %s1297_s13  }
  0x2e   : > { %1132 = vmatpush3.xpose.msk.msra.mxu0 %vm269_vm0, %v235_v34  ;;  %v193_v13 = vld [vmem:[%s1411_s20] sm:$0xff]  ;;  %s1033_s20 = sshll.u32 %s178_s16, 1  ;;  %s944_s30 = scalar_lea.sflag [#allocation3], %s178_s16 }
  0x2f   : > { %1172 = vmatpush3.xpose.msk.msra.mxu1 %vm467_vm1, %v203_v35  ;;  %1133 = vmatprep.subr.msk.mxu0 %vm269_vm0, %v250_v36  ;;  %s180_s25 = scalar_lea.vmem [#allocation2], %s1033_s20 }
  0x30   : > { %1173 = vmatprep.subr.msk.mxu1 %vm467_vm1, %v218_v37  ;;  %s958_s26 = sshll.u32 %s180_s25, 4  ;;  %s959_s26 = int_to_ptr.vmem [resolvable:$true] %s958_s26 }
  0x31   : > { %s1245_s4 = scalar_lea.vmem %s959_s26, 32  ;;  %p1252_p0 = scmp.lt.s32.totalorder %s959_s26, %s1250_s6 }
  0x32   : > { %1134 = vmatpush3.xpose.msk.msra.mxu0 %vm269_vm0, %v234_v38  ;;  %p1246_p11 = scmp.ne.s32.totalorder %s959_s26, %s1245_s4  ;;  %p1253_p1 = scmp.lt.s32.totalorder %s1251_s7, %s1245_s4 }
  0x33   : > { %1174 = vmatpush3.xpose.msk.msra.mxu1 %vm467_vm1, %v202_v39  ;;  %1135 = vmatprep.subr.msk.mxu0 %vm269_vm0, %v249_v40 }
  0x34   : > { %1175 = vmatprep.subr.msk.mxu1 %vm467_vm1, %v217_v41  ;;  %p1247_p12 = pnand %p1246_p11, %p1366_p5  ;;  %p1254_p2 = por %p1253_p1, %p1252_p0 }
  0x36   : > { %1136 = vmatpush3.xpose.msk.msra.mxu0 %vm269_vm0, %v233_v42  ;;  %p1248_p13 = pneg %p1247_p12 }
  0x37   : > { %1176 = vmatpush3.xpose.msk.msra.mxu1 %vm467_vm1, %v201_v43  ;;  %1137 = vmatprep.subr.msk.mxu0 %vm269_vm0, %v248_v44 }
  0x38   : > { %1177 = vmatprep.subr.msk.mxu1 %vm467_vm1, %v216_v45  ;;  %p1255_p3 = pnand %p1254_p2, %p1248_p13 }
  0x3a   : > { %1138 = vmatpush3.xpose.msk.msra.mxu0 %vm269_vm0, %v232_v46 }
  0x3b   : > { %1178 = vmatpush3.xpose.msk.msra.mxu1 %vm467_vm1, %v200_v47  ;;  %1139 = vmatprep.subr.msk.mxu0 %vm269_vm0, %v247_v48 }
  0x3c   : > { %1179 = vmatprep.subr.msk.mxu1 %vm467_vm1, %v215_v49 }
  0x3e   : > { %1140 = vmatpush3.xpose.msk.msra.mxu0 %vm269_vm0, %v231_v50 }
  0x3f   : > { %1180 = vmatpush3.xpose.msk.msra.mxu1 %vm467_vm1, %v199_v51  ;;  %1141 = vmatprep.subr.msk.mxu0 %vm269_vm0, %v246_v52 }
  0x40   : > { %1181 = vmatprep.subr.msk.mxu1 %vm467_vm1, %v214_v53 }
  0x42   : > { %1142 = vmatpush3.xpose.msk.msra.mxu0 %vm269_vm0, %v230_v54 }
  0x43   : > { %1182 = vmatpush3.xpose.msk.msra.mxu1 %vm467_vm1, %v198_v55  ;;  %1143 = vmatprep.subr.msk.mxu0 %vm269_vm0, %v245_v56 }
  0x44   : > { %1183 = vmatprep.subr.msk.mxu1 %vm467_vm1, %v213_v57 }
  0x46   : > { %1144 = vmatpush3.xpose.msk.msra.mxu0 %vm269_vm0, %v229_v58 }
  0x47   : > { %1184 = vmatpush3.xpose.msk.msra.mxu1 %vm467_vm1, %v197_v59  ;;  %1145 = vmatprep.subr.msk.mxu0 %vm269_vm0, %v244_v60 }
  0x48   : > { %1185 = vmatprep.subr.msk.mxu1 %vm467_vm1, %v212_v61 }
  0x4a   : > { %1146 = vmatpush3.xpose.msk.msra.mxu0 %vm269_vm0, %v228_v62 }
  0x4b   : > { %1186 = vmatpush3.xpose.msk.msra.mxu1 %vm467_vm1, %v196_v63  ;;  %1147 = vmatprep.subr.msk.mxu0 %vm269_vm0, %v243_v2  ;;  %v701_v63 = vld [vmem:[%s1654_s2 + $0x60] sm:$0xff]  ;;  %v702_v2 = vld [vmem:[%s1654_s2 + $0x68] sm:$0xff] }
  0x4c   : > { %1187 = vmatprep.subr.msk.mxu1 %vm467_vm1, %v211_v3  ;;  %v703_v3 = vld [vmem:[%s1654_s2 + $0x70] sm:$0xff] }
  0x4e   : > { %1148 = vmatpush3.xpose.msk.msra.mxu0 %vm269_vm0, %v227_v4  ;;  %v704_v4 = vld [vmem:[%s1654_s2 + $0x78] sm:$0xff] }
  0x4f   : > { %1188 = vmatpush3.xpose.msk.msra.mxu1 %vm467_vm1, %v195_v5  ;;  %1149 = vmatprep.subr.msk.mxu0 %vm269_vm0, %v242_v6 }
  0x50   : > { %1189 = vmatprep.subr.msk.mxu1 %vm467_vm1, %v210_v7 }
  0x52   : > { %1150 = vmatpush3.xpose.msk.msra.mxu0 %vm269_vm0, %v226_v8 }
  0x53   : > { %1190 = vmatpush3.xpose.msk.msra.mxu1 %vm467_vm1, %v194_v9  ;;  %1151 = vmatprep.subr.msk.mxu0 %vm269_vm0, %v241_v10 }
  0x54   : > { %1191 = vmatprep.subr.msk.mxu1 %vm467_vm1, %v209_v11 }
  0x56   : > { %1152 = vmatpush3.xpose.msk.msra.mxu0 %vm269_vm0, %v225_v12 }
  0x57   : > { %1192 = vmatpush3.xpose.msk.msra.mxu1 %vm467_vm1, %v193_v13 }
  0x59   : > { %1154 = vmatmul.mubr.msk.f32.vlgmr.msra.gmra.mxu0 %vm269_vm0, %v1381_v0  ;;  %v264_v0 = vld [vmem:[%s1654_s2 + $0x38] sm:$0xff] }
  0x5a   : > { %1194 = vmatmul.mubr.msk.f32.vlgmr.msra.gmra.mxu1 %vm467_vm1, %v1386_v1  ;;  %1155 = vmatprep.mubr.msk.f32.mxu0 %vm269_vm0, %v262_v14  ;;  %v260_v1 = vld [vmem:[%s1654_s2 + $0x18] sm:$0xff] }
  0x5b   : > { %1195 = vmatprep.mubr.msk.f32.mxu1 %vm467_vm1, %v258_v15 }
  0x5d   : > { %1156 = vmatmul.mubr.msk.f32.gmra.mxu0 %vm269_vm0, %v262_v14 }
  0x5e   : > { %1196 = vmatmul.mubr.msk.f32.gmra.mxu1 %vm467_vm1, %v258_v15  ;;  %1157 = vmatprep.mubr.msk.f32.mxu0 %vm269_vm0, %v263_v16 }
  0x5f   : > { %1197 = vmatprep.mubr.msk.f32.mxu1 %vm467_vm1, %v259_v17 }
  0x61   : > { %1158 = vmatmul.mubr.msk.f32.gmra.mxu0 %vm269_vm0, %v263_v16 }
  0x62   : > { %1198 = vmatmul.mubr.msk.f32.gmra.mxu1 %vm467_vm1, %v259_v17  ;;  %1159 = vmatprep.mubr.msk.f32.mxu0 %vm269_vm0, %v264_v0 }
  0x63   : > { %1199 = vmatprep.mubr.msk.f32.mxu1 %vm467_vm1, %v260_v1 }
  0x65   : > { %1160 = vmatmul.mubr.msk.f32.gmra.mxu0 %vm269_vm0, %v264_v0 }
  0x66   : > { %1200 = vmatmul.mubr.msk.f32.gmra.mxu1 %vm467_vm1, %v260_v1  ;;  %806 = vmatprep.mubr.f32.mxu0 %v1308_v18 }
  0x67   : > { %913 = vmatprep.mubr.f32.mxu1 %v1308_v18 }
  0x91   : > { %v683_v29 = vpop.permute.xlu0 %682  ;;  %v673_v34 = vpop.permute.xlu1 %672 }
  0x95   : > { %v678_v42 = vpop.permute.xlu0 %677 }
  0x97   : > { %v668_v50 = vpop.permute.xlu1 %667 }
  0x99   : > { %v727_v10 = vpop.permute.xlu0 %726 }
  0x9b   : > { %v722_v12 = vpop.permute.xlu1 %721 }
  0x9d   : > { %v717_v0 = vpop.permute.xlu0 %716 }
 0x119   : > { %v444_v19 = vpop.f32.mrf.mxu0 }
 0x11a   : > { %v642_v20 = vpop.f32.mrf.mxu1 }
 0x11b   : > { %v446_v21 = vpop.f32.mrf.mxu0  ;;  %v643_v48 = vadd.f32 %v642_v20, %v444_v19  ;;  %v712_v20 = vpop.permute.xlu1 %711 }
 0x11c   : > { %v644_v22 = vpop.f32.mrf.mxu1 }
 0x11d   : > { %v450_v23 = vpop.f32.mrf.mxu0  ;;  %v645_v45 = vadd.f32 %v644_v22, %v446_v21  ;;  %v685_v57 = vadd.f32 %v668_v50, %v643_v48 }
 0x11e   : > { %v648_v24 = vpop.f32.mrf.mxu1 }
 0x11f   : > { %v452_v25 = vpop.f32.mrf.mxu0  ;;  %v649_v43 = vadd.f32 %v648_v24, %v450_v23  ;;  %v686_v55 = vadd.f32 %v668_v50, %v645_v45  ;;  %v693_v62 = vmax.f32 %v685_v57, 0.0 }
 0x120   : > { %v650_v26 = vpop.f32.mrf.mxu1 }
 0x121   : > { %v456_v27 = vpop.f32.mrf.mxu0  ;;  %v651_v40 = vadd.f32 %v650_v26, %v452_v25  ;;  %v687_v53 = vadd.f32 %v673_v34, %v649_v43  ;;  %v694_v61 = vmax.f32 %v686_v55, 0.0 }
 0x122   : > { %v654_v28 = vpop.f32.mrf.mxu1 }
 0x123   : > { %v458_v30 = vpop.f32.mrf.mxu0  ;;  %v655_v37 = vadd.f32 %v654_v28, %v456_v27  ;;  %v688_v51 = vadd.f32 %v673_v34, %v651_v40  ;;  %v695_v60 = vmax.f32 %v687_v53, 0.0  ;;  %v926_v34 = vlaneseq }
 0x124   : > { %v656_v31 = vpop.f32.mrf.mxu1 }
 0x125   : > { %v462_v32 = vpop.f32.mrf.mxu0  ;;  %v657_v35 = vadd.f32 %v656_v31, %v458_v30  ;;  %v689_v49 = vadd.f32 %v678_v42, %v655_v37  ;;  %v696_v59 = vmax.f32 %v688_v51, 0.0  ;;  %v839_v31 = vld [vmem:[%s1654_s2 + $0xa0] sm:$0x1]  ;;  %vm940_vm3 = vcmp.lt.s32.totalorder %v926_v34, 256 }
 0x126   : > { %v660_v33 = vpop.f32.mrf.mxu1 }
 0x127   : > { %v661_v36 = vadd.f32 %v660_v33, %v462_v32  ;;  %v464_v38 = vpop.f32.mrf.mxu0  ;;  %v690_v46 = vadd.f32 %v678_v42, %v657_v35  ;;  %v697_v58 = vmax.f32 %v689_v49, 0.0  ;;  %v1309_v32 = vmov 1966171168  }
 0x128   : > { %v662_v39 = vpop.f32.mrf.mxu1  ;;  %v924_v33 = vunpack.c.l.s4 %v1309_v32 }
 0x129   : > { %v663_v41 = vadd.f32 %v662_v39, %v464_v38  ;;  %v691_v44 = vadd.f32 %v683_v29, %v661_v36  ;;  %v698_v56 = vmax.f32 %v690_v46, 0.0  ;;  %v927_v36 = vshrl.u32 %v926_v34, 7  ;;  %v844_v38 = vpop.permute.xlu0 %843 }
 0x12a   : > { %v925_v35 = vunpack.c.0.s8 %v924_v33 }
 0x12b   : > { %v692_v47 = vadd.f32 %v683_v29, %v663_v41  ;;  %v699_v54 = vmax.f32 %v691_v44, 0.0 }
 0x12c   : > { %v928_v42 = vsub.s32 %v925_v35, %v927_v36 }
 0x12d   : > { %v700_v52 = vmax.f32 %v692_v47, 0.0 }
 0x12f   : > { %766 = vmatprep.subr.mxu0 %v700_v52 }
 0x130   : > { %767 = vmatpush1.msra.mxu0 %v699_v54 }
 0x131   : > { %768 = vmatprep.subr.mxu0 %v698_v56 }
 0x132   : > { %769 = vmatpush1.msra.mxu0 %v697_v58 }
 0x133   : > { %770 = vmatprep.subr.mxu0 %v696_v59 }
 0x134   : > { %771 = vmatpush1.msra.mxu0 %v695_v60 }
 0x135   : > { %772 = vmatprep.subr.mxu0 %v694_v61 }
 0x136   : > { %773 = vmatpush1.msra.mxu0 %v693_v62 }
 0x137   : > { %1110 = vmatmul.mubr.msk.f32.vlgmr.msra.gmra.mxu0 %vm729_vm2, %v701_v63 }
 0x138   : > { %812 = vmatprep.mubr.f32.mxu0 %v1308_v18 }
 0x13b   : > { %1111 = vmatmul.mubr.msk.f32.gmra.mxu0 %vm729_vm2, %v702_v2 }
 0x13c   : > { %818 = vmatprep.mubr.f32.mxu0 %v1308_v18 }
 0x13f   : > { %1112 = vmatmul.mubr.msk.f32.gmra.mxu0 %vm729_vm2, %v703_v3 }
 0x140   : > { %824 = vmatprep.mubr.f32.mxu0 %v1308_v18 }
 0x143   : > { %1113 = vmatmul.mubr.msk.f32.gmra.mxu0 %vm729_vm2, %v704_v4 }
 0x1f7   : > { %v808_v5 = vpop.f32.mrf.mxu0 }
 0x1f8   : > { %v809_v25 = vadd.f32 %v808_v5, %v712_v20 }
 0x1f9   : > { %v810_v6 = vpop.f32.mrf.mxu0 }
 0x1fa   : > { %v811_v23 = vadd.f32 %v810_v6, %v712_v20  ;;  %v831_v30 = vmax.f32 %v809_v25, 0.0 }
 0x1fb   : > { %v814_v7 = vpop.f32.mrf.mxu0 }
 0x1fc   : > { %v815_v21 = vadd.f32 %v814_v7, %v717_v0  ;;  %v832_v29 = vmax.f32 %v811_v23, 0.0 }
 0x1fd   : > { %v816_v8 = vpop.f32.mrf.mxu0 }
 0x1fe   : > { %v817_v18 = vadd.f32 %v816_v8, %v717_v0  ;;  %v833_v28 = vmax.f32 %v815_v21, 0.0 }
 0x1ff   : > { %v820_v9 = vpop.f32.mrf.mxu0 }
 0x200   : > { %v821_v1 = vadd.f32 %v820_v9, %v722_v12  ;;  %v834_v27 = vmax.f32 %v817_v18, 0.0 }
 0x201   : > { %v822_v11 = vpop.f32.mrf.mxu0 }
 0x202   : > { %v823_v16 = vadd.f32 %v822_v11, %v722_v12  ;;  %v835_v26 = vmax.f32 %v821_v1, 0.0 }
 0x203   : > { %v826_v13 = vpop.f32.mrf.mxu0 }
 0x204   : > { %v827_v14 = vadd.f32 %v826_v13, %v727_v10  ;;  %v836_v24 = vmax.f32 %v823_v16, 0.0 }
 0x205   : > { %v828_v15 = vpop.f32.mrf.mxu0 }
 0x206   : > { %v829_v17 = vadd.f32 %v828_v15, %v727_v10  ;;  %v837_v22 = vmax.f32 %v827_v14, 0.0 }
 0x208   : > { %v838_v19 = vmax.f32 %v829_v17, 0.0 }
 0x20a   : > { %873 = vmatprep.subr.mxu1 %v838_v19 }
 0x20b   : > { %874 = vmatpush1.msra.mxu1 %v837_v22 }
 0x20c   : > { %875 = vmatprep.subr.mxu1 %v836_v24 }
 0x20d   : > { %876 = vmatpush1.msra.mxu1 %v835_v26 }
 0x20e   : > { %877 = vmatprep.subr.mxu1 %v834_v27 }
 0x20f   : > { %878 = vmatpush1.msra.mxu1 %v833_v28 }
 0x210   : > { %879 = vmatprep.subr.mxu1 %v832_v29 }
 0x211   : > { %880 = vmatpush1.msra.mxu1 %v831_v30 }
 0x212   : > { %1114 = vmatmul.mubr.msk.f32.vlgmr.msra.gmra.mxu1 %vm729_vm2, %v839_v31 }
 0x2d2   : > { %v915_v37 = vpop.f32.mrf.mxu1 }
 0x2d3   : > { %v916_v40 = vadd.f32 %v915_v37, %v844_v38 }
 0x2d4   : > { %v917_v39 = vpop.f32.mrf.mxu1 }
 0x2d5   : > { %v918_v41 = vadd.f32 %v917_v39, %v844_v38 }
 0x2d7   : > { %v922_v43 = vcombine.low %v916_v40, %v918_v41 }
 0x2d9   : > { %v929_v44 = vrot.slane %v922_v43, %v928_v42 }
 0x2db   : > { %v936_v45 = vrot.slane %v929_v44, %v928_v42 }
 0x2dd   : > { %942 = vst.msk [vmem:[%s180_s25] sm:$0x3] %vm940_vm3, %v936_v45 }
 0x2de   : > { %1258 = shalt.err (!%p1255_p3)
}
 0x2df   : > { %s1259_s8 = scalar_lea.hbm %s956_s29, 32  ;;  %s1263_s10 = scalar_lea.hbm %s1655_s3, 128 }
 0x2e0   : > { %p1260_p4 = scmp.ne.s32.totalorder %s956_s29, %s1259_s8  ;;  %p1264_p9 = scmp.lt.s32.totalorder %s956_s29, %s1655_s3 }
 0x2e1   : > { %p1265_p10 = scmp.lt.s32.totalorder %s1263_s10, %s1259_s8 }
 0x2e2   : > { %p1261_p7 = pnand %p1260_p4, %p1366_p5 }
 0x2e3   : > { %p1266_p11 = por %p1265_p10, %p1264_p9 }
 0x2e4   : > { %p1262_p8 = pneg %p1261_p7 }
 0x2e6   : > { %p1267_p12 = pnand %p1266_p11, %p1262_p8 }
 0x2e8   : > { %1270 = shalt.err (!%p1267_p12)
}
 0x2e9   : > { %1201 = dma.vmem_to_hbm [thread:$0]  (%p1366_p5), %s959_s26, 32, %s956_s29, %s944_s30  }
 0x2ea PF: > { %p1207_p13 = scmp.ge.s32.totalorder %s1305_s15, 2  ;;  %s970_s19 = sand.u32 1, %s1293_s12  }
 0x2eb   : > { %s971_s16 = scalar_lea.sflag [#allocation3], %s970_s19 }
 0x2ec   : > { %p1204_p0 = pnand %p1207_p13, %p1370_p6 }
 0x2ee   : > { %p1205_p1 = pneg %p1204_p0 }
 0x2f0   : > { %1288 = dma.done.wait (%p1205_p1), %s971_s16, 32  }
 0x2f1   : > { %1290 = vsyncadd (%p1205_p1), %s971_s16, 4294967264  ;;  %p13_p2 = scmp.ge.s32.totalorder %s1354_s18, 6   ;;  %s1658_s12 = smov %s1297_s13 }
 0x2f2   : > { %s1659_s13 = smov %s1301_s14  ;;  %s1660_s14 = smov %s1364_s21 }
 0x2f3   : > { %s1661_s15 = smov %s1354_s18  ;;  %15 = sbr.rel (!%p13_p2) target bundleno = 3 (0x3), region = 70 }
 0x2f8   :  { %976 = vsyncpa [#allocation3], 1 }
 0x2f9   :  { %978 = vsyncpa [#allocation3 + $0x1], 1 }

</bundles_post_ra>
